<compile_context>
chip_gen: v7x
topology: tpu7x:2x2x1
jax: 0.10.0
libtpu: 0.0.40
codegen_flags: <defaults>
</compile_context>

<pallas_src>
import jax
import jax.numpy as jnp
from jax import lax
from jax.experimental import pallas as pl
from jax.experimental.pallas import tpu as pltpu


def _conv_kernel(p_ref, w_ref, b_ref, o_ref):
    """One batch element per grid step.

    p_ref: (1, K*K*C_in, H*W)  im2col patch slab (VMEM, lane-dense)
    w_ref: (C_out, K*K*C_in)   flattened conv weights
    b_ref: (C_out, 1)          bias column (broadcasts over lanes)
    o_ref: (1, C_out, H*W)     lane-dense output slab
    """
    acc = jnp.dot(w_ref[...], p_ref[0], preferred_element_type=jnp.float32)
    acc = acc + b_ref[...]                       # single broadcast VPU add
    o_ref[0] = acc.astype(o_ref.dtype)


def final_conv_block(x_nchw, weight_oihw, bias, *, filter_size=3,
                     padding_mode="reflect"):
    """Forward pass of _final_conv_block. x_nchw: (N, C_in, H, W)."""
    N, C_in, H, W = x_nchw.shape
    C_out = weight_oihw.shape[0]
    K = filter_size
    p = K // 2
    HW = H * W
    KKC = K * K * C_in

    # ---- Glue (plain JAX): reflect pad + im2col + weight/bias re-layout ----
    x_pad = jnp.pad(x_nchw, ((0, 0), (0, 0), (p, p), (p, p)), mode=padding_mode)
    taps = [x_pad[:, :, dy:dy + H, dx:dx + W]          # each (N, C_in, H, W)
            for dy in range(K) for dx in range(K)]
    patch = jnp.stack(taps, axis=1).reshape(N, KKC, HW)          # (N, KKC, HW)
    # w_flat[o, tap*C_in + c] = weight[o, c, dy, dx] with tap = dy*K + dx
    w_flat = jnp.transpose(weight_oihw, (0, 2, 3, 1)).reshape(C_out, KKC)
    b_col = bias.reshape(C_out, 1).astype(jnp.float32)

    out = pl.pallas_call(
        _conv_kernel,
        out_shape=jax.ShapeDtypeStruct((N, C_out, HW), x_nchw.dtype),
        grid_spec=pltpu.PrefetchScalarGridSpec(
            num_scalar_prefetch=0,
            grid=(N,),
            in_specs=[
                pl.BlockSpec((1, KKC, HW), lambda n: (n, 0, 0)),
                pl.BlockSpec((C_out, KKC), lambda n: (0, 0)),
                pl.BlockSpec((C_out, 1), lambda n: (0, 0)),
            ],
            out_specs=pl.BlockSpec((1, C_out, HW), lambda n: (n, 0, 0)),
        ),
        compiler_params=pltpu.CompilerParams(
            dimension_semantics=("parallel",),
            vmem_limit_bytes=32 * 1024 * 1024,   # safe on v5e/v6e/v7x; footprint ~100 KB
        ),
    )(patch, w_flat, b_col)

    return out.reshape(N, C_out, H, W)           # free reshape back to NCHW


def _reference(x_nchw, weight_oihw, bias, K):
    p = K // 2
    x_pad = jnp.pad(x_nchw, ((0, 0), (0, 0), (p, p), (p, p)), mode="reflect")
    out = lax.conv_general_dilated(
        x_pad.astype(jnp.float32), weight_oihw.astype(jnp.float32),
        window_strides=(1, 1), padding="VALID",
        dimension_numbers=("NCHW", "OIHW", "NCHW"))
    return out + bias.reshape(1, -1, 1, 1)


if __name__ == "__main__":
    # Small shapes consistent with the module: N=2, C_in=4, C_out=4, 16x16.
    N, C_in, C_out, H, W, K = 2, 4, 4, 16, 16, 3

    key = jax.random.PRNGKey(0)
    kx, kw, kb = jax.random.split(key, 3)

    x = jax.random.normal(kx, (N, C_in, H, W), dtype=jnp.float32)

    # Deterministic Conv2d-style init (uniform in +/- 1/sqrt(fan_in)).
    fan_in = C_in * K * K
    bound = 1.0 / jnp.sqrt(fan_in)
    weight = jax.random.uniform(kw, (C_out, C_in, K, K), jnp.float32,
                                -bound, bound)
    bias = jax.random.uniform(kb, (C_out,), jnp.float32, -bound, bound)

    out = final_conv_block(x, weight, bias, filter_size=K,
                           padding_mode="reflect")
    out = jax.block_until_ready(out)

    ref = jax.block_until_ready(_reference(x, weight, bias, K))
    assert out.shape == (N, C_out, H, W)
    assert jnp.allclose(out, ref, atol=1e-4, rtol=1e-4)

    print("KERNEL_OK")
</pallas_src>

<mosaic_0001>
module attributes {stable_mosaic.version = 11 : i64} {
  func.func @_conv_kernel(%arg0: i32, %arg1: memref<1x36x256xf32, #tpu.memory_space<vmem>>, %arg2: memref<4x36xf32, #tpu.memory_space<vmem>>, %arg3: memref<4x1xf32, #tpu.memory_space<vmem>>, %arg4: memref<1x4x256xf32, #tpu.memory_space<vmem>>) attributes {dimension_semantics = [#tpu.dimension_semantics<parallel>], iteration_bounds = array<i64: 2>, scalar_prefetch = 0 : i64, scratch_operands = 0 : i64, tpu.core_type = #tpu.core_type<tc>, window_params = [{transform_indices = @transform_0, window_bounds = array<i64: 1, 36, 256>}, {pipeline_mode = #tpu.pipeline_mode<synchronous>, transform_indices = @transform_1, window_bounds = array<i64: 4, 36>}, {pipeline_mode = #tpu.pipeline_mode<synchronous>, transform_indices = @transform_2, window_bounds = array<i64: 4, 1>}, {transform_indices = @transform_3, window_bounds = array<i64: 1, 4, 256>}]} {
    %c0 = arith.constant 0 : index
    %c0_0 = arith.constant 0 : index
    %0 = vector.load %arg2[%c0, %c0_0] : memref<4x36xf32, #tpu.memory_space<vmem>>, vector<4x36xf32>
    %c0_1 = arith.constant 0 : index
    %c0_2 = arith.constant 0 : index
    %c0_3 = arith.constant 0 : index
    %1 = vector.load %arg1[%c0_1, %c0_2, %c0_3] : memref<1x36x256xf32, #tpu.memory_space<vmem>>, vector<1x36x256xf32>
    %2 = vector.shape_cast %1 : vector<1x36x256xf32> to vector<36x256xf32>
    %cst = arith.constant dense<0.000000e+00> : vector<4x256xf32>
    %3 = tpu.matmul %0, %2, %cst {dimension_numbers = #tpu.dot_dimension_numbers<[1], [0], [0], [1], [0, 0, 1, 1], [], []>} : vector<4x36xf32>, vector<36x256xf32>, vector<4x256xf32> -> vector<4x256xf32>
    %c0_4 = arith.constant 0 : index
    %c0_5 = arith.constant 0 : index
    %4 = vector.load %arg3[%c0_4, %c0_5] : memref<4x1xf32, #tpu.memory_space<vmem>>, vector<4x1xf32>
    %5 = vector.broadcast %4 : vector<4x1xf32> to vector<4x256xf32>
    %6 = arith.addf %3, %5 : vector<4x256xf32>
    %c0_6 = arith.constant 0 : index
    %c0_7 = arith.constant 0 : index
    %c0_8 = arith.constant 0 : index
    %7 = vector.load %arg4[%c0_6, %c0_7, %c0_8] : memref<1x4x256xf32, #tpu.memory_space<vmem>>, vector<1x4x256xf32>
    %8 = vector.shape_cast %7 : vector<1x4x256xf32> to vector<4x256xf32>
    %9 = vector.shape_cast %6 : vector<4x256xf32> to vector<1x4x256xf32>
    tpu.vector_store %arg4[%c0_6, %c0_7, %c0_8], %9 {strides = array<i32>} : memref<1x4x256xf32, #tpu.memory_space<vmem>>, vector<1x4x256xf32>,
    return
  }
  func.func @transform_0(%arg0: i32) -> (i32, i32, i32) {
    %c0_i32 = arith.constant 0 : i32
    %c0_i32_0 = arith.constant 0 : i32
    %c0_i32_1 = arith.constant 0 : i32
    return %arg0, %c0_i32, %c0_i32_0 : i32, i32, i32
  }
  func.func @transform_1(%arg0: i32) -> (i32, i32) {
    %c0_i32 = arith.constant 0 : i32
    %c0_i32_0 = arith.constant 0 : i32
    %c0_i32_1 = arith.constant 0 : i32
    return %c0_i32, %c0_i32_0 : i32, i32
  }
  func.func @transform_2(%arg0: i32) -> (i32, i32) {
    %c0_i32 = arith.constant 0 : i32
    %c0_i32_0 = arith.constant 0 : i32
    %c0_i32_1 = arith.constant 0 : i32
    return %c0_i32, %c0_i32_0 : i32, i32
  }
  func.func @transform_3(%arg0: i32) -> (i32, i32, i32) {
    %c0_i32 = arith.constant 0 : i32
    %c0_i32_0 = arith.constant 0 : i32
    %c0_i32_1 = arith.constant 0 : i32
    return %arg0, %c0_i32, %c0_i32_0 : i32, i32, i32
  }
}

</mosaic_0001>

<bundles_post_ra>
// kernel: tpu_custom_call.1
= control target key start
LH: loop header
LB: loop body
LE: loop exit
PB: predicated region body
PF: predicated region fallthrough
CT: control target
= control target key end

     0   :  { %8 = vsyncpa [#allocation3], 0  ;;  %s606_s0 = inlined_call_operand.vmem [shape: f32[2,36,256], index: 0, kind: input, shape index: {}]   ;;  %s607_s1 = inlined_call_operand.vmem [shape: f32[4,36], index: 1, kind: input, shape index: {}]   ;;  %s608_s2 = inlined_call_operand.vmem [shape: f32[4,1], index: 2, kind: input, shape index: {}]   ;;  %s609_s3 = inlined_call_operand.hbm [shape: f32[2,4,256], index: 3, kind: output, shape index: {}]  }
   0x1   :  { %10 = vsyncpa [#allocation3 + $0x1], 0  ;;  %s500_s12 = smov 0   ;;  %s502_s13 = smov 0  }
   0x2   :  { %s504_s14 = smov 0   ;;  %s506_s15 = smov 0  }
   0x3 LB: > { %s521_s16 = sadd.s32 4294967295, %s475_s15   ;;  %s347_s17 = sadd.s32 4294967294, %s475_s15   ;;  %s475_s15 = sphi %s506_s15, %s615_s15   ;;  %s471_s14 = sphi %s504_s14, %s614_s14   ;;  %s467_s13 = sphi %s502_s13, %s613_s13   ;;  %s463_s12 = sphi %s500_s12, %s612_s12  }
   0x4   : > { %s525_s18 = sadd.s32 1, %s475_s15   ;;  %s91_s19 = sadd.s32 1, %s471_s14 }
   0x5   : > { %s88_s20 = ssub.s32 %s475_s15, %s525_s18  ;;  %p101_p0 = scmp.ne.s32.totalorder %s471_s14, %s467_s13 }
   0x6   : > { %p89_p1 = scmp.eq.s32.totalorder %s88_s20, 0  ;;  %p102_p2 = scmp.eq.s32.totalorder %s521_s16, 1 }
   0x7   : > { %p107_p3 = scmp.ne.s32.totalorder %s467_s13, %s463_s12  ;;  %p108_p4 = scmp.eq.s32.totalorder %s347_s17, 1 }
   0x8   : > { %s536_s21 = scalar_select %p89_p1, %s471_s14, %s91_s19  }
   0x9   : > { %p538_p5 = por %p102_p2, %p101_p0  ;;  %p542_p6 = por %p108_p4, %p107_p3 }
   0xa   : > { %p350_p7 = scmp.ge.s32.totalorder %s475_s15, 1  ;;  %p140_p8 = scmp.lt.s32.totalorder %s475_s15, 3 }
   0xc   : > { %p141_p9 = pnand %p350_p7, %p140_p8 }
   0xd   : > { %p164_p10 = scmp.lt.s32.totalorder (!%p141_p9), %s521_s16, 1  ;;  %v477_v0 = vmov (!%p141_p9), 0.0   ;;  %v180_v1 = vld [vmem:[%s608_s2] sm:$0xf] (!%p141_p9)  ;;  %v478_v2 = vmov (!%p141_p9), 0   ;;  %vm190_vm0 = vcmask (!%p141_p9), 1043456  }
   0xe   : > { %144 = sbr.rel (%p141_p9) target bundleno = 270 (0x10e), region = 32  ;;  %261 = vmatprep.mubr.f32.mxu0 (!%p141_p9), %v477_v0  ;;  %412 = vset.pattern.permute.xlu0 (!%p141_p9), %v478_v2  ;;  %v169_v17 = vld [vmem:[%s607_s1] sm:$0xf] (!%p141_p9)  ;;  %vm186_vm1 = vcmask (!%p141_p9), 293888   ;;  %s161_s6 = sand.u32 (!%p141_p9), 1, %s467_s13  }
   0xf   : > { %183 = vperm.xlu0 (!%p141_p9), %412, %v180_v1   ;;  %s351_s7 = sshll.u32 (!%p141_p9), %s161_s6, 3  ;;  %s361_s8 = sshll.u32 (!%p141_p9), %s521_s16, 7 }
  0x10   : > { %s163_s9 = scalar_lea.vmem (!%p141_p9), [#allocation2], %s351_s7  ;;  %s564_s19 = scalar_lea.hbm (!%p141_p9), %s609_s3, %s361_s8 }
  0x11   : > { %s288_s10 = sshll.u32 (!%p141_p9), %s163_s9, 4  ;;  %s274_s20 = scalar_lea.sflag (!%p141_p9), [#allocation3], %s161_s6  ;;  %s566_s10 = int_to_ptr.vmem [resolvable:$true] %s288_s10 }
  0x12   : > { %s413_s24 = scalar_lea.vmem (!%p141_p9), %s566_s10, 128 }
  0x13   : > { %p414_p11 = scmp.ne.s32.totalorder (!%p141_p9), %s566_s10, %s413_s24 }
  0x15   : > { %s165_s26 = scalar_select %p164_p10, %s521_s16, 1 }
  0x16   : > { %p415_p12 = pnand %p414_p11, %p538_p5  ;;  %s479_s16 = smov [#allocation2]  }
  0x17   : > { %s370_s27 = smul.u32 80, %s165_s26  ;;  %s417_s25 = sshll.u32 %s479_s16, 4  ;;  %s418_s25 = int_to_ptr.vmem [resolvable:$false] %s417_s25 }
  0x18   : > { %p416_p13 = pneg %p415_p12  ;;  %s419_s26 = scalar_lea.vmem %s418_s25, 256 }
  0x19   : > { %s168_s30 = scalar_lea.vmem %s606_s0, %s370_s27  ;;  %p420_p0 = scmp.lt.s32.totalorder %s566_s10, %s418_s25 }
  0x1a   : > { %v171_v3 = vld [vmem:[%s168_s30 + $0x8] sm:$0xff]  ;;  %v173_v4 = vld [vmem:[%s168_s30 + $0x18] sm:$0xff]  ;;  %v170_v5 = vld [vmem:[%s168_s30] sm:$0xff]  ;;  %p421_p1 = scmp.lt.s32.totalorder %s419_s26, %s413_s24 }
  0x1b   : > { %v362_v6 = vpack.c.bf16 %v173_v4, %v171_v3  ;;  %v172_v7 = vld [vmem:[%s168_s30 + $0x10] sm:$0xff]  ;;  %v175_v8 = vld [vmem:[%s168_s30 + $0x28] sm:$0xff]  ;;  %v177_v9 = vld [vmem:[%s168_s30 + $0x38] sm:$0xff] }
  0x1c   : > { %v364_v10 = vpack.c.bf16 %v172_v7, %v170_v5  ;;  %v366_v11 = vpack.c.bf16 %v177_v9, %v175_v8  ;;  %v174_v12 = vld [vmem:[%s168_s30 + $0x20] sm:$0xff]  ;;  %v176_v13 = vld [vmem:[%s168_s30 + $0x30] sm:$0xff]  ;;  %v179_v15 = vld [vmem:[%s168_s30 + $0x48] sm:$0xf]  ;;  %p422_p2 = por %p421_p1, %p420_p0 }
  0x1d   : > { %363 = vmatprep.subr.bf16.mxu0 %v362_v6  ;;  %v368_v14 = vpack.c.bf16 %v176_v13, %v174_v12  ;;  %v178_v16 = vld [vmem:[%s168_s30 + $0x40] sm:$0xf] }
  0x1e   : > { %365 = vmatpush1.bf16.msra.mxu0 %v364_v10  ;;  %p423_p3 = pnand %p422_p2, %p416_p13 }
  0x1f   : > { %367 = vmatprep.subr.bf16.mxu0 %v366_v11 }
  0x22   : > { %369 = vmatpush1.bf16.msra.mxu0 %v368_v14 }
  0x23   : > { %353 = vmatprep.subr.msk.mxu0 %vm190_vm0, %v179_v15 }
  0x26   : > { %354 = vmatpush1.msk.msra.mxu0 %vm190_vm0, %v178_v16 }
  0x27   : > { %355 = vmatmul.mubr.msk.f32.vlgmr.msra.gmra.mrb[0].mxu0 %vm186_vm1, %v169_v17 }
  0x8e   : > { %v184_v18 = vpop.permute.xlu0 %183 }
  0xfa   : > { %v263_v19 = vpop.f32.mrb[0].mxu0 }
  0xfb   : > { %v264_v20 = vadd.f32 %v263_v19, %v184_v18  ;;  %v265_v21 = vpop.f32.mrb[1].mxu0 }
  0xfc   : > { %v266_v22 = vadd.f32 %v265_v21, %v184_v18 }
  0xfe   : > { %v270_v23 = vcombine.low %v264_v20, %v266_v22 }
 0x100   : > { %272 = vst [vmem:[%s163_s9] sm:$0xff] %v270_v23 }
 0x101   : > { %426 = shalt.err (!%p423_p3)
}
 0x102   : > { %s427_s27 = scalar_lea.hbm %s564_s19, 128  ;;  %s431_s30 = scalar_lea.hbm %s609_s3, 256 }
 0x103   : > { %p428_p4 = scmp.ne.s32.totalorder %s564_s19, %s427_s27  ;;  %p432_p9 = scmp.lt.u32.totalorder %s564_s19, %s609_s3 }
 0x104   : > { %p433_p10 = scmp.lt.u32.totalorder %s431_s30, %s427_s27  ;;  %p435_p12 = scmp.lt.u32.totalorder %s427_s27, %s564_s19 }
 0x105   : > { %p429_p7 = pnand %p428_p4, %p538_p5 }
 0x106   : > { %p434_p11 = por %p433_p10, %p432_p9 }
 0x107   : > { %p430_p8 = pneg %p429_p7 }
 0x108   : > { %p436_p13 = por %p435_p12, %p434_p11 }
 0x10a   : > { %p437_p0 = pnand %p436_p13, %p430_p8 }
 0x10c   : > { %440 = shalt.err (!%p437_p0)
}
 0x10d   : > { %371 = dma.vmem_to_hbm [thread:$0]  (%p538_p5), %s566_s10, 128, %s564_s19, %s274_s20  }
 0x10e PF: > { %p377_p1 = scmp.ge.s32.totalorder %s475_s15, 2  ;;  %s300_s6 = sand.u32 1, %s463_s12  }
 0x10f   : > { %s301_s7 = scalar_lea.sflag [#allocation3], %s300_s6 }
 0x110   : > { %p374_p2 = pnand %p377_p1, %p542_p6 }
 0x112   : > { %458 = dma.done.wait (!%p374_p2), %s301_s7, 128  }
 0x113   : > { %460 = vsyncadd (!%p374_p2), %s301_s7, 4294967168  ;;  %p13_p3 = scmp.ge.s32.totalorder %s525_s18, 4   ;;  %s612_s12 = smov %s467_s13 }
 0x114   : > { %s613_s13 = smov %s471_s14  ;;  %s614_s14 = smov %s536_s21 }
 0x115   : > { %s615_s15 = smov %s525_s18  ;;  %15 = sbr.rel (!%p13_p3) target bundleno = 3 (0x3), region = 67 }
 0x11c   :  { %306 = vsyncpa [#allocation3], 1 }
 0x11d   :  { %308 = vsyncpa [#allocation3 + $0x1], 1 }

</bundles_post_ra>
